<compile_context>
chip_gen: v7x
topology: tpu7x:2x2x1
jax: 0.10.0
libtpu: 0.0.40
codegen_flags: <defaults>
</compile_context>

<pallas_src>
import functools

import jax
import jax.numpy as jnp
from jax.experimental import pallas as pl
from jax.experimental.pallas import tpu as pltpu


def _round_up(x, m):
    return ((x + m - 1) // m) * m


def _vmem_capacity_bytes():
    """Generation-aware physical VMEM capacity, with a conservative fallback."""
    try:
        cap = int(pltpu.get_tpu_info().vmem_capacity_bytes)
        if cap > 0:
            return cap
    except Exception:
        pass
    return 64 << 20  # conservative: fits every listed generation (v7x has 64 MiB)


def _ffn_kernel(x_ref, w1_ref, b1_ref, w2_ref, b2_ref, o_ref, acc_ref):
    # x_ref: (tm, dim_p) native dtype; w1_ref: (dim_p, ht); b1_ref: (1, ht) f32
    # w2_ref: (ht, dim_p); b2_ref: (1, dim_p) f32; o_ref: (tm, dim_p)
    # acc_ref: (tm, dim_p) f32 accumulator, private to this row tile / core.
    k = pl.program_id(1)

    @pl.when(k == 0)
    def _():
        acc_ref[...] = jnp.zeros_like(acc_ref)

    # Linear 1 (this hidden slice): native-dtype operands on the MXU, f32 accumulate.
    h = jnp.dot(x_ref[...], w1_ref[...], preferred_element_type=jnp.float32)
    h = h + b1_ref[...]

    # Exact (erf-based) GELU, matching torch.nn.GELU default.  VPU/EUP work rides in
    # otherwise-idle bundle slots while the MXU is the saturating unit.
    h = 0.5 * h * (1.0 + jax.lax.erf(h * jnp.float32(0.7071067811865476)))

    # Dropout(p=0.0) is the identity (inference).
    # TODO(synk): dropout > 0 (training) would need pltpu.prng_seed / prng_random_bits.

    # Linear 2 partial product over this hidden slice; cast back to the weight dtype
    # for the fast MXU path (no-op when everything is f32), accumulate in f32.
    acc_ref[...] += jnp.dot(h.astype(w2_ref.dtype), w2_ref[...],
                            preferred_element_type=jnp.float32)

    @pl.when(k == pl.num_programs(1) - 1)
    def _():
        o_ref[...] = (acc_ref[...] + b2_ref[...]).astype(o_ref.dtype)


@functools.partial(jax.jit, static_argnames=("tm",))
def feed_forward(x, w1, b1, w2, b2, *, tm=None):
    """x: (batch, seq, dim) -> (batch, seq, dim)."""
    batch, seq, dim = x.shape
    hidden = w1.shape[1]
    m = batch * seq

    xb = jnp.dtype(x.dtype).itemsize
    wb = jnp.dtype(w1.dtype).itemsize

    # Lane-dense feature padding (no-op for real transformer dims, which are already
    # multiples of 128).
    dim_p = max(_round_up(dim, 128), 128)
    hid_p = max(_round_up(hidden, 128), 128)

    # Sublane packing multiple for the activation dtype (f32 -> 8, bf16 -> 16, ...).
    sub = 8 * max(1, 4 // xb)

    # ---- Generation-aware VMEM budget and tile selection ----------------------
    vmem_cap = _vmem_capacity_bytes()
    budget = max(int(vmem_cap * 0.8) - (2 << 20), 8 << 20)

    # Hidden tile: <= 2048 lanes, an exact multiple-of-128 divisor of hid_p (so no
    # extra hidden padding), and small enough that the double-buffered W1/W2 blocks
    # take <= ~half the budget -> VMEM use is independent of the full hidden size.
    ht_budget = max(((budget // 2) // max(4 * dim_p * wb, 1)) // 128 * 128, 128)
    ht_cap = max(min(2048, ht_budget, hid_p), 128)
    hid_tile = 128
    for t in range(128, ht_cap + 1, 128):
        if hid_p % t == 0:
            hid_tile = t
    n_hid = hid_p // hid_tile

    # Row tile: target 512 to amortize the ~0.35us/step pipeline overhead and keep
    # the MXU fed, derived down from the remaining VMEM so it never overflows the
    # 64 MiB parts, and clamped so tiny inputs don't over-pad.
    per_row = 4 * dim_p * xb + dim_p * 4 + 3 * hid_tile * 4
    remaining = budget - 4 * dim_p * hid_tile * wb - 4 * (hid_tile + dim_p) * 4
    tm_fit = max((max(remaining, 0) // per_row) // sub * sub, sub)
    tm_target = 512 if tm is None else int(tm)

    # Row padding only for degenerate m < one sublane-packed tile; otherwise the
    # partial last block replaces the old pad + slice HBM copies entirely.
    row_pad = max(sub - m, 0)
    m_rows = m + row_pad
    tm_eff = max(min(_round_up(tm_target, sub), tm_fit, (m_rows // sub) * sub), sub)

    # ---- Padding (feature axes only, when not already 128-aligned) ------------
    x2d = x.reshape(m, dim)
    if row_pad or dim_p != dim:
        x2d = jnp.pad(x2d, ((0, row_pad), (0, dim_p - dim)))
    if (dim_p != dim) or (hid_p != hidden):
        w1 = jnp.pad(w1, ((0, dim_p - dim), (0, hid_p - hidden)))
        w2 = jnp.pad(w2, ((0, hid_p - hidden), (0, dim_p - dim)))
        b1 = jnp.pad(b1, (0, hid_p - hidden))
        b2 = jnp.pad(b2, (0, dim_p - dim))
    b1_2d = b1.reshape(1, hid_p).astype(jnp.float32)
    b2_2d = b2.reshape(1, dim_p).astype(jnp.float32)

    grid = (pl.cdiv(m_rows, tm_eff), n_hid)

    # VMEM estimate: double-buffered x/out tiles, double-buffered W1/W2/bias tiles,
    # f32 accumulator scratch, and the f32 hidden intermediates of one hidden slice.
    est = (4 * tm_eff * dim_p * xb
           + 4 * dim_p * hid_tile * wb
           + 4 * (hid_tile + dim_p) * 4
           + tm_eff * dim_p * 4
           + 3 * tm_eff * hid_tile * 4)
    vmem_limit = int(min(max(est * 1.25 + (4 << 20), 16 << 20),
                         vmem_cap - (4 << 20)))

    flops = 2 * m_rows * (dim_p * hid_p + hid_p * dim_p)
    weight_reads = grid[0] if n_hid > 1 else 1
    bytes_accessed = (2 * m_rows * dim_p * xb
                      + weight_reads * (dim_p * hid_p + hid_p * dim_p) * wb
                      + (hid_p + dim_p) * 4)

    out2d = pl.pallas_call(
        _ffn_kernel,
        out_shape=jax.ShapeDtypeStruct((m_rows, dim_p), x.dtype),
        grid_spec=pltpu.PrefetchScalarGridSpec(
            num_scalar_prefetch=0,
            grid=grid,
            in_specs=[
                pl.BlockSpec((tm_eff, dim_p), lambda i, k: (i, 0)),    # x row tile
                pl.BlockSpec((dim_p, hid_tile), lambda i, k: (0, k)),  # W1 hidden slice
                pl.BlockSpec((1, hid_tile), lambda i, k: (0, k)),      # b1 hidden slice
                pl.BlockSpec((hid_tile, dim_p), lambda i, k: (k, 0)),  # W2 hidden slice
                pl.BlockSpec((1, dim_p), lambda i, k: (0, 0)),         # b2
            ],
            out_specs=pl.BlockSpec((tm_eff, dim_p), lambda i, k: (i, 0)),
            scratch_shapes=[pltpu.VMEM((tm_eff, dim_p), jnp.float32)],
        ),
        compiler_params=pltpu.CompilerParams(
            dimension_semantics=("parallel", "arbitrary"),  # rows across TCs, hidden sequential
            vmem_limit_bytes=vmem_limit,
        ),
        cost_estimate=pl.CostEstimate(
            flops=flops,
            transcendentals=m_rows * hid_p,
            bytes_accessed=bytes_accessed,
        ),
    )(x2d, w1, b1_2d, w2, b2_2d)

    if row_pad or dim_p != dim:
        out2d = out2d[:m, :dim]
    return out2d.reshape(batch, seq, dim)


def _reference(x, w1, b1, w2, b2):
    h = x.astype(jnp.float32) @ w1.astype(jnp.float32) + b1.astype(jnp.float32)
    h = 0.5 * h * (1.0 + jax.lax.erf(h / jnp.sqrt(jnp.float32(2.0))))
    out = h @ w2.astype(jnp.float32) + b2.astype(jnp.float32)
    return out.astype(x.dtype)


if __name__ == "__main__":
    # Small shapes consistent with FeedForward(dim, hidden_dim):
    batch, seq, dim, hidden = 2, 8, 32, 64

    key = jax.random.PRNGKey(0)
    kx, k1, k2, k3, k4 = jax.random.split(key, 5)

    x = jax.random.normal(kx, (batch, seq, dim), dtype=jnp.float32)

    # Deterministic parameter init (uniform, scaled by 1/sqrt(fan_in), like torch Linear).
    lim1 = 1.0 / jnp.sqrt(jnp.float32(dim))
    lim2 = 1.0 / jnp.sqrt(jnp.float32(hidden))
    w1 = jax.random.uniform(k1, (dim, hidden), jnp.float32, -lim1, lim1)
    b1 = jax.random.uniform(k2, (hidden,), jnp.float32, -lim1, lim1)
    w2 = jax.random.uniform(k3, (hidden, dim), jnp.float32, -lim2, lim2)
    b2 = jax.random.uniform(k4, (dim,), jnp.float32, -lim2, lim2)

    out = jax.block_until_ready(feed_forward(x, w1, b1, w2, b2))
    ref = _reference(x, w1, b1, w2, b2)
    assert out.shape == (batch, seq, dim)
    assert jnp.allclose(out, ref, atol=1e-4, rtol=1e-4)

    # Ragged row count (m not a multiple of the row tile): exercises the partial
    # last-block path that replaced the old row padding + output-slice copies.
    x_ragged = jax.random.normal(kx, (2, 7, dim), dtype=jnp.float32)
    out_r = jax.block_until_ready(feed_forward(x_ragged, w1, b1, w2, b2))
    ref_r = _reference(x_ragged, w1, b1, w2, b2)
    assert out_r.shape == (2, 7, dim)
    assert jnp.allclose(out_r, ref_r, atol=1e-4, rtol=1e-4)

    print("KERNEL_OK")
</pallas_src>

<mosaic_0001>
module attributes {stable_mosaic.version = 11 : i64} {
  func.func @_ffn_kernel(%arg0: i32, %arg1: i32, %arg2: memref<16x128xf32, #tpu.memory_space<vmem>>, %arg3: memref<128x128xf32, #tpu.memory_space<vmem>>, %arg4: memref<1x128xf32, #tpu.memory_space<vmem>>, %arg5: memref<128x128xf32, #tpu.memory_space<vmem>>, %arg6: memref<1x128xf32, #tpu.memory_space<vmem>>, %arg7: memref<16x128xf32, #tpu.memory_space<vmem>>, %arg8: memref<16x128xf32, #tpu.memory_space<vmem>>) attributes {dimension_semantics = [#tpu.dimension_semantics<parallel>, #tpu.dimension_semantics<arbitrary>], iteration_bounds = array<i64: 1, 1>, scalar_prefetch = 0 : i64, scratch_operands = 1 : i64, tpu.core_type = #tpu.core_type<tc>, window_params = [{transform_indices = @transform_0, window_bounds = array<i64: 16, 128>}, {transform_indices = @transform_1, window_bounds = array<i64: 128, 128>}, {transform_indices = @transform_2, window_bounds = array<i64: 1, 128>}, {transform_indices = @transform_3, window_bounds = array<i64: 128, 128>}, {pipeline_mode = #tpu.pipeline_mode<synchronous>, transform_indices = @transform_4, window_bounds = array<i64: 1, 128>}, {transform_indices = @transform_5, window_bounds = array<i64: 16, 128>}]} {
    %c0_i32 = arith.constant 0 : i32
    %0 = arith.cmpi eq, %arg1, %c0_i32 : i32
    %1 = arith.extui %0 : i1 to i32
    %c0_i32_0 = arith.constant 0 : i32
    %2 = arith.cmpi ne, %1, %c0_i32_0 : i32
    scf.if %2 {
      %cst_18 = arith.constant 0.000000e+00 : f32
      %25 = vector.broadcast %cst_18 : f32 to vector<16x128xf32>
      %c0_19 = arith.constant 0 : index
      %c0_20 = arith.constant 0 : index
      %26 = vector.load %arg8[%c0_19, %c0_20] : memref<16x128xf32, #tpu.memory_space<vmem>>, vector<16x128xf32>
      tpu.vector_store %arg8[%c0_19, %c0_20], %25 {strides = array<i32>} : memref<16x128xf32, #tpu.memory_space<vmem>>, vector<16x128xf32>,
    } else {
    }
    %c0 = arith.constant 0 : index
    %c0_1 = arith.constant 0 : index
    %3 = vector.load %arg2[%c0, %c0_1] : memref<16x128xf32, #tpu.memory_space<vmem>>, vector<16x128xf32>
    %c0_2 = arith.constant 0 : index
    %c0_3 = arith.constant 0 : index
    %4 = vector.load %arg3[%c0_2, %c0_3] : memref<128x128xf32, #tpu.memory_space<vmem>>, vector<128x128xf32>
    %cst = arith.constant dense<0.000000e+00> : vector<16x128xf32>
    %5 = tpu.matmul %3, %4, %cst {dimension_numbers = #tpu.dot_dimension_numbers<[1], [0], [0], [1], [0, 0, 1, 1], [], []>} : vector<16x128xf32>, vector<128x128xf32>, vector<16x128xf32> -> vector<16x128xf32>
    %c0_4 = arith.constant 0 : index
    %c0_5 = arith.constant 0 : index
    %6 = vector.load %arg4[%c0_4, %c0_5] : memref<1x128xf32, #tpu.memory_space<vmem>>, vector<1x128xf32>
    %7 = vector.broadcast %6 : vector<1x128xf32> to vector<16x128xf32>
    %8 = arith.addf %5, %7 : vector<16x128xf32>
    %cst_6 = arith.constant 5.000000e-01 : f32
    %9 = vector.broadcast %cst_6 : f32 to vector<16x128xf32>
    %10 = arith.mulf %9, %8 : vector<16x128xf32>
    %cst_7 = arith.constant 0.707106769 : f32
    %11 = vector.broadcast %cst_7 : f32 to vector<16x128xf32>
    %12 = arith.mulf %8, %11 : vector<16x128xf32>
    %13 = math.erf %12 : vector<16x128xf32>
    %cst_8 = arith.constant 1.000000e+00 : f32
    %14 = vector.broadcast %cst_8 : f32 to vector<16x128xf32>
    %15 = arith.addf %14, %13 : vector<16x128xf32>
    %16 = arith.mulf %10, %15 : vector<16x128xf32>
    %c0_9 = arith.constant 0 : index
    %c0_10 = arith.constant 0 : index
    %17 = vector.load %arg8[%c0_9, %c0_10] : memref<16x128xf32, #tpu.memory_space<vmem>>, vector<16x128xf32>
    %c0_11 = arith.constant 0 : index
    %c0_12 = arith.constant 0 : index
    %18 = vector.load %arg5[%c0_11, %c0_12] : memref<128x128xf32, #tpu.memory_space<vmem>>, vector<128x128xf32>
    %cst_13 = arith.constant dense<0.000000e+00> : vector<16x128xf32>
    %19 = tpu.matmul %16, %18, %cst_13 {dimension_numbers = #tpu.dot_dimension_numbers<[1], [0], [0], [1], [0, 0, 1, 1], [], []>} : vector<16x128xf32>, vector<128x128xf32>, vector<16x128xf32> -> vector<16x128xf32>
    %20 = arith.addf %17, %19 : vector<16x128xf32>
    %c0_14 = arith.constant 0 : index
    %c0_15 = arith.constant 0 : index
    %21 = vector.load %arg8[%c0_14, %c0_15] : memref<16x128xf32, #tpu.memory_space<vmem>>, vector<16x128xf32>
    tpu.vector_store %arg8[%c0_14, %c0_15], %20 {strides = array<i32>} : memref<16x128xf32, #tpu.memory_space<vmem>>, vector<16x128xf32>,
    %c0_i32_16 = arith.constant 0 : i32
    %22 = arith.cmpi eq, %arg1, %c0_i32_16 : i32
    %23 = arith.extui %22 : i1 to i32
    %c0_i32_17 = arith.constant 0 : i32
    %24 = arith.cmpi ne, %23, %c0_i32_17 : i32
    scf.if %24 {
      %c0_18 = arith.constant 0 : index
      %c0_19 = arith.constant 0 : index
      %25 = vector.load %arg8[%c0_18, %c0_19] : memref<16x128xf32, #tpu.memory_space<vmem>>, vector<16x128xf32>
      %c0_20 = arith.constant 0 : index
      %c0_21 = arith.constant 0 : index
      %26 = vector.load %arg6[%c0_20, %c0_21] : memref<1x128xf32, #tpu.memory_space<vmem>>, vector<1x128xf32>
      %27 = vector.broadcast %26 : vector<1x128xf32> to vector<16x128xf32>
      %28 = arith.addf %25, %27 : vector<16x128xf32>
      %c0_22 = arith.constant 0 : index
      %c0_23 = arith.constant 0 : index
      %29 = vector.load %arg7[%c0_22, %c0_23] : memref<16x128xf32, #tpu.memory_space<vmem>>, vector<16x128xf32>
      tpu.vector_store %arg7[%c0_22, %c0_23], %28 {strides = array<i32>} : memref<16x128xf32, #tpu.memory_space<vmem>>, vector<16x128xf32>,
    } else {
    }
    return
  }
  func.func @transform_0(%arg0: i32, %arg1: i32) -> (i32, i32) {
    %c0_i32 = arith.constant 0 : i32
    %c0_i32_0 = arith.constant 0 : i32
    return %arg0, %c0_i32 : i32, i32
  }
  func.func @transform_1(%arg0: i32, %arg1: i32) -> (i32, i32) {
    %c0_i32 = arith.constant 0 : i32
    %c0_i32_0 = arith.constant 0 : i32
    return %c0_i32, %arg1 : i32, i32
  }
  func.func @transform_2(%arg0: i32, %arg1: i32) -> (i32, i32) {
    %c0_i32 = arith.constant 0 : i32
    %c0_i32_0 = arith.constant 0 : i32
    return %c0_i32, %arg1 : i32, i32
  }
  func.func @transform_3(%arg0: i32, %arg1: i32) -> (i32, i32) {
    %c0_i32 = arith.constant 0 : i32
    %c0_i32_0 = arith.constant 0 : i32
    return %arg1, %c0_i32 : i32, i32
  }
  func.func @transform_4(%arg0: i32, %arg1: i32) -> (i32, i32) {
    %c0_i32 = arith.constant 0 : i32
    %c0_i32_0 = arith.constant 0 : i32
    %c0_i32_1 = arith.constant 0 : i32
    return %c0_i32, %c0_i32_0 : i32, i32
  }
  func.func @transform_5(%arg0: i32, %arg1: i32) -> (i32, i32) {
    %c0_i32 = arith.constant 0 : i32
    %c0_i32_0 = arith.constant 0 : i32
    return %arg0, %c0_i32 : i32, i32
  }
}

</mosaic_0001>

<bundles_post_ra>
// kernel: feed_forward.1
= control target key start
LH: loop header
LB: loop body
LE: loop exit
PB: predicated region body
PF: predicated region fallthrough
CT: control target
= control target key end

     0   :  { %s573_s1 = inlined_call_operand.vmem [shape: f32[128,128], index: 1, kind: input, shape index: {}]   ;;  %s574_s0 = inlined_call_operand.vmem [shape: f32[16,128], index: 0, kind: input, shape index: {}]   ;;  %s575_s3 = inlined_call_operand.vmem [shape: f32[128,128], index: 3, kind: input, shape index: {}]   ;;  %s576_s2 = inlined_call_operand.vmem [shape: f32[1,128], index: 2, kind: input, shape index: {}]   ;;  %s577_s4 = inlined_call_operand.vmem [shape: f32[1,128], index: 4, kind: input, shape index: {}]   ;;  %s578_s5 = inlined_call_operand.vmem [shape: f32[16,128], index: 5, kind: output, shape index: {}]  }
   0x1   :  { %v28_v0 = vld [vmem:[%s573_s1] sm:$0xff]  ;;  %v29_v1 = vld [vmem:[%s573_s1 + $0x8] sm:$0xff]  ;;  %v30_v2 = vld [vmem:[%s573_s1 + $0x10] sm:$0xff] }
   0x2   :  { %v361_v3 = vpack.c.bf16 %v29_v1, %v28_v0  ;;  %v31_v4 = vld [vmem:[%s573_s1 + $0x18] sm:$0xff]  ;;  %v32_v6 = vld [vmem:[%s573_s1 + $0x20] sm:$0xff]  ;;  %v33_v7 = vld [vmem:[%s573_s1 + $0x28] sm:$0xff] }
   0x3   :  { %v365_v5 = vpack.c.bf16 %v31_v4, %v30_v2  ;;  %v369_v8 = vpack.c.bf16 %v33_v7, %v32_v6  ;;  %v34_v9 = vld [vmem:[%s573_s1 + $0x30] sm:$0xff]  ;;  %v35_v10 = vld [vmem:[%s573_s1 + $0x38] sm:$0xff]  ;;  %v26_v11 = vld [vmem:[%s574_s0] sm:$0xff] }
   0x4   :  { %362 = vmatprep.subr.bf16.mxu0 %v361_v3  ;;  %323 = vmatprep.mubr.f32.mxu0 %v26_v11  ;;  %v138_v12 = vld [vmem:[%s575_s3] sm:$0xff]  ;;  %v139_v13 = vld [vmem:[%s575_s3 + $0x8] sm:$0xff]  ;;  %v140_v14 = vld [vmem:[%s575_s3 + $0x10] sm:$0xff]  ;;  %v373_v20 = vpack.c.bf16 %v35_v10, %v34_v9 }
   0x5   :  { %364 = vmatpush3.bf16.msra.mxu0 %v361_v3  ;;  %v393_v15 = vpack.c.bf16 %v139_v13, %v138_v12  ;;  %v141_v16 = vld [vmem:[%s575_s3 + $0x18] sm:$0xff]  ;;  %v142_v18 = vld [vmem:[%s575_s3 + $0x20] sm:$0xff]  ;;  %v143_v19 = vld [vmem:[%s575_s3 + $0x28] sm:$0xff] }
   0x6   :  { %366 = vmatprep.subr.bf16.mxu0 %v365_v5  ;;  %v397_v17 = vpack.c.bf16 %v141_v16, %v140_v14  ;;  %v36_v21 = vld [vmem:[%s573_s1 + $0x40] sm:$0xff]  ;;  %v37_v22 = vld [vmem:[%s573_s1 + $0x48] sm:$0xff]  ;;  %v401_v23 = vpack.c.bf16 %v143_v19, %v142_v18  ;;  %v38_v25 = vld [vmem:[%s573_s1 + $0x50] sm:$0xff] }
   0x7   :  { %394 = vmatprep.subr.bf16.mxu1 %v393_v15  ;;  %v377_v24 = vpack.c.bf16 %v37_v22, %v36_v21  ;;  %v39_v26 = vld [vmem:[%s573_s1 + $0x58] sm:$0xff]  ;;  %v40_v28 = vld [vmem:[%s573_s1 + $0x60] sm:$0xff]  ;;  %v41_v29 = vld [vmem:[%s573_s1 + $0x68] sm:$0xff] }
   0x8   :  { %396 = vmatpush3.bf16.msra.mxu1 %v393_v15  ;;  %v381_v27 = vpack.c.bf16 %v39_v26, %v38_v25  ;;  %v385_v30 = vpack.c.bf16 %v41_v29, %v40_v28  ;;  %v42_v31 = vld [vmem:[%s573_s1 + $0x70] sm:$0xff]  ;;  %v43_v32 = vld [vmem:[%s573_s1 + $0x78] sm:$0xff]  ;;  %v27_v34 = vld [vmem:[%s574_s0 + $0x8] sm:$0xff] }
   0x9   :  { %368 = vmatpush3.bf16.msra.mxu0 %v365_v5  ;;  %398 = vmatprep.subr.bf16.mxu1 %v397_v17  ;;  %v389_v33 = vpack.c.bf16 %v43_v32, %v42_v31  ;;  %v144_v35 = vld [vmem:[%s575_s3 + $0x30] sm:$0xff]  ;;  %v145_v36 = vld [vmem:[%s575_s3 + $0x38] sm:$0xff]  ;;  %v146_v38 = vld [vmem:[%s575_s3 + $0x40] sm:$0xff] }
   0xa   :  { %370 = vmatprep.subr.bf16.mxu0 %v369_v8  ;;  %v405_v37 = vpack.c.bf16 %v145_v36, %v144_v35  ;;  %v147_v39 = vld [vmem:[%s575_s3 + $0x48] sm:$0xff]  ;;  %v148_v41 = vld [vmem:[%s575_s3 + $0x50] sm:$0xff]  ;;  %v149_v42 = vld [vmem:[%s575_s3 + $0x58] sm:$0xff] }
   0xb   :  { %v409_v40 = vpack.c.bf16 %v147_v39, %v146_v38  ;;  %v413_v43 = vpack.c.bf16 %v149_v42, %v148_v41  ;;  %v150_v44 = vld [vmem:[%s575_s3 + $0x60] sm:$0xff]  ;;  %v151_v45 = vld [vmem:[%s575_s3 + $0x68] sm:$0xff]  ;;  %v152_v47 = vld [vmem:[%s575_s3 + $0x70] sm:$0xff] }
   0xc   :  { %400 = vmatpush3.bf16.msra.mxu1 %v397_v17  ;;  %v417_v46 = vpack.c.bf16 %v151_v45, %v150_v44  ;;  %v153_v48 = vld [vmem:[%s575_s3 + $0x78] sm:$0xff]  ;;  %v253_v50 = vld [vmem:[%s576_s2] ss:$0 sm:$0xff] }
   0xd   :  { %372 = vmatpush3.bf16.msra.mxu0 %v369_v8  ;;  %402 = vmatprep.subr.bf16.mxu1 %v401_v23  ;;  %v421_v49 = vpack.c.bf16 %v153_v48, %v152_v47  ;;  %v254_v1 = vld [vmem:[%s577_s4] ss:$0 sm:$0xff] }
   0xe   :  { %374 = vmatprep.subr.bf16.mxu0 %v373_v20 }
  0x10   :  { %404 = vmatpush3.bf16.msra.mxu1 %v401_v23 }
  0x11   :  { %376 = vmatpush3.bf16.msra.mxu0 %v373_v20  ;;  %406 = vmatprep.subr.bf16.mxu1 %v405_v37 }
  0x12   :  { %378 = vmatprep.subr.bf16.mxu0 %v377_v24 }
  0x14   :  { %408 = vmatpush3.bf16.msra.mxu1 %v405_v37 }
  0x15   :  { %380 = vmatpush3.bf16.msra.mxu0 %v377_v24  ;;  %410 = vmatprep.subr.bf16.mxu1 %v409_v40 }
  0x16   :  { %382 = vmatprep.subr.bf16.mxu0 %v381_v27 }
  0x18   :  { %412 = vmatpush3.bf16.msra.mxu1 %v409_v40 }
  0x19   :  { %384 = vmatpush3.bf16.msra.mxu0 %v381_v27  ;;  %414 = vmatprep.subr.bf16.mxu1 %v413_v43 }
  0x1a   :  { %386 = vmatprep.subr.bf16.mxu0 %v385_v30 }
  0x1c   :  { %416 = vmatpush3.bf16.msra.mxu1 %v413_v43 }
  0x1d   :  { %388 = vmatpush3.bf16.msra.mxu0 %v385_v30  ;;  %418 = vmatprep.subr.bf16.mxu1 %v417_v46 }
  0x1e   :  { %390 = vmatprep.subr.bf16.mxu0 %v389_v33 }
  0x20   :  { %420 = vmatpush3.bf16.msra.mxu1 %v417_v46 }
  0x21   :  { %392 = vmatpush3.bf16.msra.mxu0 %v389_v33  ;;  %422 = vmatprep.subr.bf16.mxu1 %v421_v49 }
  0x24   :  { %324 = vmatmul.mubr.f32.vlgmr.msra.gmra.mrb[0].mxu0 %v27_v34  ;;  %424 = vmatpush3.bf16.msra.mxu1 %v421_v49 }
  0xf7   :  { %v325_v51 = vpop.f32.mrb[0].mxu0 }
  0xf8   :  { %v123_v52 = vadd.f32 %v325_v51, %v253_v50  ;;  %v117_v53 = vpop.f32.mrb[1].mxu0 }
  0xf9   :  { %v118_v54 = vadd.f32 %v253_v50, %v117_v53 }
  0xfa   :  { %v129_v55 = vmul.f32 0.70710677, %v123_v52  ;;  %v127_v62 = vmul.f32 0.5, %v123_v52 }
  0xfb   :  { %v128_v56 = vmul.f32 0.70710677, %v118_v54  ;;  %v126_v60 = vmul.f32 0.5, %v118_v54 }
  0xfc   :  { %425 = verf.f32 %v129_v55 }
  0xfd   :  { %427 = verf.f32 %v128_v56 }
 0x106   :  { %v426_v57 = vpop.eup %425 }
 0x107   :  { %v428_v58 = vpop.eup %427  ;;  %v133_v59 = vadd.f32 1.0, %v426_v57 }
 0x108   :  { %v132_v61 = vadd.f32 1.0, %v428_v58 }
 0x109   :  { %v135_v0 = vmul.f32 %v133_v59, %v127_v62 }
 0x10a   :  { %v134_v63 = vmul.f32 %v132_v61, %v126_v60 }
 0x10c   :  { %358 = vmatprep.mubr.f32.mxu1 %v134_v63 }
 0x10d   :  { %359 = vmatmul.mubr.f32.vlgmr.msra.gmra.mrb[0].mxu1 %v135_v0 }
 0x1e0   :  { %v360_v2 = vpop.f32.mrb[0].mxu1 }
 0x1e1   :  { %v246_v3 = vadd.f32 %v360_v2, %v254_v1  ;;  %v220_v4 = vpop.f32.mrb[1].mxu1 }
 0x1e2   :  { %v245_v5 = vadd.f32 %v254_v1, %v220_v4 }
 0x1e3   :  { %248 = vst [vmem:[%s578_s5 + $0x8] sm:$0xff] %v246_v3 }
 0x1e4   :  { %247 = vst [vmem:[%s578_s5] sm:$0xff] %v245_v5 }

</bundles_post_ra>
